<compile_context>
chip_gen: v7x
topology: tpu7x:2x2x1
jax: 0.10.0
libtpu: 0.0.40
codegen_flags: <defaults>
</compile_context>

<pallas_src>
import functools

import jax
import jax.numpy as jnp
from jax.experimental import pallas as pl
from jax.experimental.pallas import tpu as pltpu

LANE = 128
SUBLANE = 8


def _round_up(x, m):
    return (x + m - 1) // m * m


# ---------------------------------------------------------------------------
# Kernel: 5 MXU matmuls on one lane-padded (TB, P) activation, weights resident.
# Identical body for the grid-less (whole array) and batch-tiled cases.
# ---------------------------------------------------------------------------
def actor_critic_kernel(x_ref, w_ref, b_ref, out_ref, *, pos_off, pos_dim):
    x = x_ref[...]

    # lidar_compress_net (runs under torch.no_grad(); value-wise identical).
    # Position lanes [pos_off, pos_off+pos_dim) hit all-zero weight rows, so
    # they do not perturb the lidar path.
    h = jnp.dot(x, w_ref[0], preferred_element_type=jnp.float32) + b_ref[0]
    h = jnp.maximum(h, 0.0)
    h = jnp.dot(h, w_ref[1], preferred_element_type=jnp.float32) + b_ref[1]
    h = jnp.maximum(h, 0.0)
    lf = jnp.dot(h, w_ref[2], preferred_element_type=jnp.float32) + b_ref[2]
    # lf: lanes [0, F) hold the lidar feature; every other lane is exactly 0.

    # concat([lidar_feature, position]) without a second operand: keep only the
    # position lanes of the raw input and add them to lf.  The l1 weight slab
    # has its position rows relocated to the same lanes, so a single dot
    # reproduces l1(concat(...)) exactly.
    lane = jax.lax.broadcasted_iota(jnp.int32, x.shape, 1)
    pos_part = jnp.where((lane >= pos_off) & (lane < pos_off + pos_dim), x, 0.0)
    state = lf + pos_part

    p = jnp.tanh(jnp.dot(state, w_ref[3], preferred_element_type=jnp.float32) + b_ref[3])
    p = jnp.tanh(jnp.dot(p, w_ref[4], preferred_element_type=jnp.float32) + b_ref[4])

    out_ref[...] = p.astype(out_ref.dtype)


# ---------------------------------------------------------------------------
# Parameter construction / packing (wrapper-side, done once).
# ---------------------------------------------------------------------------
def make_params(key, lidar_state_dim, position_state_dim, lidar_feature_dim, hidden_dim):
    """Deterministic synthetic params.  Weights stored (in, out) so the kernel
    computes x @ W + b (equivalent to torch's x @ W_t.T + b)."""
    ks = jax.random.split(key, 5)
    f32 = jnp.float32

    def lin(k, fan_in, fan_out, scale=0.1):
        kw, kb = jax.random.split(k)
        w = scale * jax.random.normal(kw, (fan_in, fan_out), f32)
        b = scale * jax.random.normal(kb, (fan_out,), f32)
        return w, b

    l1_ = lin(ks[0], lidar_state_dim, hidden_dim)                         # compress[0]
    l2_ = lin(ks[1], hidden_dim, hidden_dim)                              # compress[2]
    l3_ = lin(ks[2], hidden_dim, lidar_feature_dim)                       # compress[4]
    ll1 = lin(ks[3], lidar_feature_dim + position_state_dim, hidden_dim)  # l1 (concat in)
    ll2 = lin(ks[4], hidden_dim, hidden_dim)                              # l2
    return (l1_, l2_, l3_, ll1, ll2)


def pack_params(layers, pad_dim, lidar_feature_dim, pos_off):
    """Pack all layers into one zero-padded (5, P, P) weight slab and one
    (5, 1, P) bias slab.  Zero padding keeps the padded lanes exactly 0 through
    relu/tanh, so the padded math is exact.  The l1 weight's position-feature
    rows are relocated to rows [pos_off, pos_off+POSD) to match the lane
    placement of the position features inside the combined input slab."""
    (w1, b1), (w2, b2), (w3, b3), (wl1, bl1), (wl2, bl2) = layers
    F = lidar_feature_dim
    w_slab = jnp.zeros((5, pad_dim, pad_dim), jnp.float32)
    b_slab = jnp.zeros((5, 1, pad_dim), jnp.float32)

    for i, (w, b) in enumerate([(w1, b1), (w2, b2), (w3, b3)]):
        fi, fo = w.shape
        w_slab = w_slab.at[i, :fi, :fo].set(w)
        b_slab = b_slab.at[i, 0, :fo].set(b)

    # l1: lidar-feature rows at [0, F), position rows relocated to [pos_off, ...).
    posd = wl1.shape[0] - F
    fo = wl1.shape[1]
    w_slab = w_slab.at[3, :F, :fo].set(wl1[:F])
    w_slab = w_slab.at[3, pos_off:pos_off + posd, :fo].set(wl1[F:])
    b_slab = b_slab.at[3, 0, :fo].set(bl1)

    # l2
    fi, fo = wl2.shape
    w_slab = w_slab.at[4, :fi, :fo].set(wl2)
    b_slab = b_slab.at[4, 0, :fo].set(bl2)
    return w_slab, b_slab


# ---------------------------------------------------------------------------
# Wrapper
# ---------------------------------------------------------------------------
def actor_critic_forward(lidar_state, position_state, w_slab, b_slab, *,
                         lidar_feature_dim, hidden_dim, pos_off, block_batch=512):
    assert block_batch % SUBLANE == 0
    B, L = lidar_state.shape
    _, POSD = position_state.shape
    n_layers, P, _ = w_slab.shape
    assert pos_off >= max(L, lidar_feature_dim) and pos_off + POSD <= P

    # Batch tiling: TB rows per grid step (multiple of 8), pad batch up to Bp.
    TB = min(block_batch, _round_up(B, SUBLANE))
    Bp = _round_up(B, TB)

    # ONE lane-dense, zero-padded activation slab: lidar raw input at lanes
    # [0, L), position features at lanes [pos_off, pos_off+POSD).
    x_p = jnp.zeros((Bp, P), jnp.float32)
    x_p = x_p.at[:B, :L].set(lidar_state.astype(jnp.float32))
    x_p = x_p.at[:B, pos_off:pos_off + POSD].set(position_state.astype(jnp.float32))

    kernel = functools.partial(actor_critic_kernel, pos_off=pos_off, pos_dim=POSD)
    out_shape = jax.ShapeDtypeStruct((Bp, P), jnp.float32)

    if Bp == TB:
        # Single tile: grid-less call, every operand whole-array VMEM-resident.
        vmem = pl.BlockSpec(memory_space=pltpu.MemorySpace.VMEM)
        out_p = pl.pallas_call(
            kernel,
            out_shape=out_shape,
            in_specs=[vmem, vmem, vmem],
            out_specs=vmem,
        )(x_p, w_slab, b_slab)
    else:
        # Batch-tiled streaming kernel: activations pipelined over the batch,
        # weight/bias slabs VMEM-resident (constant index_map), batch axis parallel.
        out_p = pl.pallas_call(
            kernel,
            out_shape=out_shape,
            grid=(Bp // TB,),
            in_specs=[
                pl.BlockSpec((TB, P), lambda b: (b, 0)),
                pl.BlockSpec((n_layers, P, P), lambda b: (0, 0, 0)),
                pl.BlockSpec((n_layers, 1, P), lambda b: (0, 0, 0)),
            ],
            out_specs=pl.BlockSpec((TB, P), lambda b: (b, 0)),
            compiler_params=pltpu.CompilerParams(
                dimension_semantics=("parallel",)),
        )(x_p, w_slab, b_slab)

    return out_p[:B, :hidden_dim]


# ---------------------------------------------------------------------------
# Pure-JAX reference (mirrors the PyTorch forward exactly)
# ---------------------------------------------------------------------------
def reference_forward(lidar_state, position_state, layers):
    (w1, b1), (w2, b2), (w3, b3), (wl1, bl1), (wl2, bl2) = layers
    h = jnp.maximum(lidar_state @ w1 + b1, 0.0)
    h = jnp.maximum(h @ w2 + b2, 0.0)
    lf = h @ w3 + b3
    state = jnp.concatenate([lf, position_state], axis=-1)
    p = jnp.tanh(state @ wl1 + bl1)
    p = jnp.tanh(p @ wl2 + bl2)
    return p


if __name__ == "__main__":
    # Small shapes consistent with the module.
    lidar_state_dim = 32
    position_state_dim = 8
    lidar_feature_dim = 16
    hidden_dim = 32

    key = jax.random.PRNGKey(0)
    k_par, k_l0, k_p0, k_l1, k_p1, k_l2, k_p2 = jax.random.split(key, 7)

    layers = make_params(k_par, lidar_state_dim, position_state_dim,
                         lidar_feature_dim, hidden_dim)

    # Position lanes sit above both the raw lidar lanes and the lidar-feature lanes.
    pos_off = max(lidar_state_dim, lidar_feature_dim)
    pad_dim = _round_up(
        max(lidar_state_dim, hidden_dim,
            lidar_feature_dim + position_state_dim,
            pos_off + position_state_dim), LANE)
    w_slab, b_slab = pack_params(layers, pad_dim, lidar_feature_dim, pos_off)

    fwd = functools.partial(actor_critic_forward,
                            lidar_feature_dim=lidar_feature_dim,
                            hidden_dim=hidden_dim, pos_off=pos_off)

    # --- small batch: grid-less, whole-operand VMEM path ---------------------
    B0 = 8
    lidar0 = jax.random.normal(k_l0, (B0, lidar_state_dim), jnp.float32)
    pos0 = jax.random.normal(k_p0, (B0, position_state_dim), jnp.float32)
    out0 = jax.block_until_ready(fwd(lidar0, pos0, w_slab, b_slab))
    ref0 = reference_forward(lidar0, pos0, layers)
    assert out0.shape == (B0, hidden_dim)
    assert jnp.allclose(out0, ref0, atol=1e-4, rtol=1e-4), "small-batch mismatch"

    # --- odd batch (sublane padding) -----------------------------------------
    B2 = 3
    lidar2 = jax.random.normal(k_l2, (B2, lidar_state_dim), jnp.float32)
    pos2 = jax.random.normal(k_p2, (B2, position_state_dim), jnp.float32)
    out2 = jax.block_until_ready(fwd(lidar2, pos2, w_slab, b_slab))
    ref2 = reference_forward(lidar2, pos2, layers)
    assert out2.shape == (B2, hidden_dim)
    assert jnp.allclose(out2, ref2, atol=1e-4, rtol=1e-4), "odd-batch mismatch"

    # --- larger batch: batch-tiled, weight-resident, parallel-grid path ------
    B1 = 512
    lidar1 = jax.random.normal(k_l1, (B1, lidar_state_dim), jnp.float32)
    pos1 = jax.random.normal(k_p1, (B1, position_state_dim), jnp.float32)
    out1 = jax.block_until_ready(fwd(lidar1, pos1, w_slab, b_slab, block_batch=256))
    ref1 = reference_forward(lidar1, pos1, layers)
    assert out1.shape == (B1, hidden_dim)
    assert jnp.allclose(out1, ref1, atol=1e-4, rtol=1e-4), "tiled-batch mismatch"

    print("KERNEL_OK")
</pallas_src>

<mosaic_0001>
module attributes {stable_mosaic.version = 11 : i64} {
  func.func @actor_critic_kernel(%arg0: memref<8x128xf32, #tpu.memory_space<vmem>>, %arg1: memref<5x128x128xf32, #tpu.memory_space<vmem>>, %arg2: memref<5x1x128xf32, #tpu.memory_space<vmem>>, %arg3: memref<8x128xf32, #tpu.memory_space<vmem>>) attributes {dimension_semantics = [], scalar_prefetch = 0 : i64, scratch_operands = 0 : i64, tpu.core_type = #tpu.core_type<tc>} {
    %c0 = arith.constant 0 : index
    %c0_0 = arith.constant 0 : index
    %0 = vector.load %arg0[%c0, %c0_0] : memref<8x128xf32, #tpu.memory_space<vmem>>, vector<8x128xf32>
    %c0_1 = arith.constant 0 : index
    %c0_2 = arith.constant 0 : index
    %c0_3 = arith.constant 0 : index
    %1 = vector.load %arg1[%c0_1, %c0_2, %c0_3] : memref<5x128x128xf32, #tpu.memory_space<vmem>>, vector<1x128x128xf32>
    %2 = vector.shape_cast %1 : vector<1x128x128xf32> to vector<128x128xf32>
    %cst = arith.constant dense<0.000000e+00> : vector<8x128xf32>
    %3 = tpu.matmul %0, %2, %cst {dimension_numbers = #tpu.dot_dimension_numbers<[1], [0], [0], [1], [0, 0, 1, 1], [], []>} : vector<8x128xf32>, vector<128x128xf32>, vector<8x128xf32> -> vector<8x128xf32>
    %c0_4 = arith.constant 0 : index
    %c0_5 = arith.constant 0 : index
    %c0_6 = arith.constant 0 : index
    %4 = vector.load %arg2[%c0_4, %c0_5, %c0_6] : memref<5x1x128xf32, #tpu.memory_space<vmem>>, vector<1x1x128xf32>
    %5 = vector.shape_cast %4 : vector<1x1x128xf32> to vector<1x128xf32>
    %6 = vector.broadcast %5 : vector<1x128xf32> to vector<8x128xf32>
    %7 = arith.addf %3, %6 : vector<8x128xf32>
    %cst_7 = arith.constant 0.000000e+00 : f32
    %8 = vector.broadcast %cst_7 : f32 to vector<8x128xf32>
    %9 = arith.maximumf %7, %8 : vector<8x128xf32>
    %c1 = arith.constant 1 : index
    %c0_8 = arith.constant 0 : index
    %c0_9 = arith.constant 0 : index
    %10 = vector.load %arg1[%c1, %c0_8, %c0_9] : memref<5x128x128xf32, #tpu.memory_space<vmem>>, vector<1x128x128xf32>
    %11 = vector.shape_cast %10 : vector<1x128x128xf32> to vector<128x128xf32>
    %cst_10 = arith.constant dense<0.000000e+00> : vector<8x128xf32>
    %12 = tpu.matmul %9, %11, %cst_10 {dimension_numbers = #tpu.dot_dimension_numbers<[1], [0], [0], [1], [0, 0, 1, 1], [], []>} : vector<8x128xf32>, vector<128x128xf32>, vector<8x128xf32> -> vector<8x128xf32>
    %c1_11 = arith.constant 1 : index
    %c0_12 = arith.constant 0 : index
    %c0_13 = arith.constant 0 : index
    %13 = vector.load %arg2[%c1_11, %c0_12, %c0_13] : memref<5x1x128xf32, #tpu.memory_space<vmem>>, vector<1x1x128xf32>
    %14 = vector.shape_cast %13 : vector<1x1x128xf32> to vector<1x128xf32>
    %15 = vector.broadcast %14 : vector<1x128xf32> to vector<8x128xf32>
    %16 = arith.addf %12, %15 : vector<8x128xf32>
    %cst_14 = arith.constant 0.000000e+00 : f32
    %17 = vector.broadcast %cst_14 : f32 to vector<8x128xf32>
    %18 = arith.maximumf %16, %17 : vector<8x128xf32>
    %c2 = arith.constant 2 : index
    %c0_15 = arith.constant 0 : index
    %c0_16 = arith.constant 0 : index
    %19 = vector.load %arg1[%c2, %c0_15, %c0_16] : memref<5x128x128xf32, #tpu.memory_space<vmem>>, vector<1x128x128xf32>
    %20 = vector.shape_cast %19 : vector<1x128x128xf32> to vector<128x128xf32>
    %cst_17 = arith.constant dense<0.000000e+00> : vector<8x128xf32>
    %21 = tpu.matmul %18, %20, %cst_17 {dimension_numbers = #tpu.dot_dimension_numbers<[1], [0], [0], [1], [0, 0, 1, 1], [], []>} : vector<8x128xf32>, vector<128x128xf32>, vector<8x128xf32> -> vector<8x128xf32>
    %c2_18 = arith.constant 2 : index
    %c0_19 = arith.constant 0 : index
    %c0_20 = arith.constant 0 : index
    %22 = vector.load %arg2[%c2_18, %c0_19, %c0_20] : memref<5x1x128xf32, #tpu.memory_space<vmem>>, vector<1x1x128xf32>
    %23 = vector.shape_cast %22 : vector<1x1x128xf32> to vector<1x128xf32>
    %24 = vector.broadcast %23 : vector<1x128xf32> to vector<8x128xf32>
    %25 = arith.addf %21, %24 : vector<8x128xf32>
    %26 = tpu.iota {dimensions = array<i32: 1>} : vector<8x128xi32>
    %c32_i32 = arith.constant 32 : i32
    %27 = vector.broadcast %c32_i32 : i32 to vector<8x128xi32>
    %28 = arith.cmpi sge, %26, %27 : vector<8x128xi32>
    %c40_i32 = arith.constant 40 : i32
    %29 = vector.broadcast %c40_i32 : i32 to vector<8x128xi32>
    %30 = arith.cmpi slt, %26, %29 : vector<8x128xi32>
    %31 = arith.andi %28, %30 : vector<8x128xi1>
    %cst_21 = arith.constant 0.000000e+00 : f32
    %32 = vector.broadcast %cst_21 : f32 to vector<8x128xf32>
    %33 = arith.select %31, %0, %32 : vector<8x128xi1>, vector<8x128xf32>
    %34 = arith.addf %25, %33 : vector<8x128xf32>
    %c3 = arith.constant 3 : index
    %c0_22 = arith.constant 0 : index
    %c0_23 = arith.constant 0 : index
    %35 = vector.load %arg1[%c3, %c0_22, %c0_23] : memref<5x128x128xf32, #tpu.memory_space<vmem>>, vector<1x128x128xf32>
    %36 = vector.shape_cast %35 : vector<1x128x128xf32> to vector<128x128xf32>
    %cst_24 = arith.constant dense<0.000000e+00> : vector<8x128xf32>
    %37 = tpu.matmul %34, %36, %cst_24 {dimension_numbers = #tpu.dot_dimension_numbers<[1], [0], [0], [1], [0, 0, 1, 1], [], []>} : vector<8x128xf32>, vector<128x128xf32>, vector<8x128xf32> -> vector<8x128xf32>
    %c3_25 = arith.constant 3 : index
    %c0_26 = arith.constant 0 : index
    %c0_27 = arith.constant 0 : index
    %38 = vector.load %arg2[%c3_25, %c0_26, %c0_27] : memref<5x1x128xf32, #tpu.memory_space<vmem>>, vector<1x1x128xf32>
    %39 = vector.shape_cast %38 : vector<1x1x128xf32> to vector<1x128xf32>
    %40 = vector.broadcast %39 : vector<1x128xf32> to vector<8x128xf32>
    %41 = arith.addf %37, %40 : vector<8x128xf32>
    %42 = math.tanh %41 : vector<8x128xf32>
    %c4 = arith.constant 4 : index
    %c0_28 = arith.constant 0 : index
    %c0_29 = arith.constant 0 : index
    %43 = vector.load %arg1[%c4, %c0_28, %c0_29] : memref<5x128x128xf32, #tpu.memory_space<vmem>>, vector<1x128x128xf32>
    %44 = vector.shape_cast %43 : vector<1x128x128xf32> to vector<128x128xf32>
    %cst_30 = arith.constant dense<0.000000e+00> : vector<8x128xf32>
    %45 = tpu.matmul %42, %44, %cst_30 {dimension_numbers = #tpu.dot_dimension_numbers<[1], [0], [0], [1], [0, 0, 1, 1], [], []>} : vector<8x128xf32>, vector<128x128xf32>, vector<8x128xf32> -> vector<8x128xf32>
    %c4_31 = arith.constant 4 : index
    %c0_32 = arith.constant 0 : index
    %c0_33 = arith.constant 0 : index
    %46 = vector.load %arg2[%c4_31, %c0_32, %c0_33] : memref<5x1x128xf32, #tpu.memory_space<vmem>>, vector<1x1x128xf32>
    %47 = vector.shape_cast %46 : vector<1x1x128xf32> to vector<1x128xf32>
    %48 = vector.broadcast %47 : vector<1x128xf32> to vector<8x128xf32>
    %49 = arith.addf %45, %48 : vector<8x128xf32>
    %50 = math.tanh %49 : vector<8x128xf32>
    %c0_34 = arith.constant 0 : index
    %c0_35 = arith.constant 0 : index
    %51 = vector.load %arg3[%c0_34, %c0_35] : memref<8x128xf32, #tpu.memory_space<vmem>>, vector<8x128xf32>
    tpu.vector_store %arg3[%c0_34, %c0_35], %50 {strides = array<i32>} : memref<8x128xf32, #tpu.memory_space<vmem>>, vector<8x128xf32>,
    return
  }
}

</mosaic_0001>

<bundles_post_ra>
// kernel: tpu_custom_call.1
= control target key start
LH: loop header
LB: loop body
LE: loop exit
PB: predicated region body
PF: predicated region fallthrough
CT: control target
= control target key end

     0   :  { %8 = vsyncpa [#allocation3], 0  ;;  %s1156_s0 = inlined_call_operand.hbm [shape: f32[8,128], index: 0, kind: input, shape index: {}]   ;;  %s1157_s1 = inlined_call_operand.hbm [shape: f32[5,128,128], index: 1, kind: input, shape index: {}]   ;;  %s1158_s2 = inlined_call_operand.vmem [shape: f32[5,1,128], index: 2, kind: input, shape index: {}]   ;;  %s1159_s3 = inlined_call_operand.hbm [shape: f32[8,128], index: 3, kind: output, shape index: {}]  }
   0x1   :  { %9 = vsyncpa [#allocation6], 0 }
   0x2   :  { %10 = vsyncpa [#allocation4], 0  ;;  %s1016_s12 = smov [#allocation2]   ;;  %s1017_s14 = smov [#allocation5]  }
   0x3   :  { %s17_s13 = sshll.u32 %s1016_s12, 4  ;;  %s26_s15 = sshll.u32 %s1017_s14, 4  ;;  %s18_s13 = int_to_ptr.vmem [resolvable:$true] %s17_s13  ;;  %s1044_s15 = int_to_ptr.vmem [resolvable:$true] %s26_s15 }
   0x4   :  { %s944_s18 = scalar_lea.hbm %s1156_s0, 128 }
   0x5   :  { %p945_p0 = scmp.ne.s32.totalorder %s1156_s0, %s944_s18  ;;  %p948_p1 = scmp.lt.u32.totalorder %s944_s18, %s1156_s0 }
   0x7   :  { %p950_p2 = pnand %p948_p1, %p945_p0 }
   0x9   :  { %953 = shalt.err (!%p950_p2)
}
   0xa   :  { %s954_s23 = scalar_lea.vmem %s18_s13, 128  ;;  %p959_p4 = scmp.lt.s32.totalorder %s18_s13, %s18_s13 }
   0xb   :  { %p955_p3 = scmp.ne.s32.totalorder %s18_s13, %s954_s23  ;;  %p960_p5 = scmp.lt.s32.totalorder %s954_s23, %s954_s23 }
   0xd   :  { %p961_p6 = por %p960_p5, %p959_p4 }
   0xf   :  { %p962_p7 = pnand %p961_p6, %p955_p3 }
  0x11   :  { %965 = shalt.err (!%p962_p7)
}
  0x12   :  { %20 = dma.hbm_to_vmem [thread:$0]  %s1156_s0, 128, %s18_s13, [#allocation3]  }
  0x13   :  { %s966_s28 = scalar_lea.hbm %s1157_s1, 10240 }
  0x14   :  { %p967_p8 = scmp.ne.s32.totalorder %s1157_s1, %s966_s28  ;;  %p970_p9 = scmp.lt.u32.totalorder %s966_s28, %s1157_s1 }
  0x16   :  { %p972_p10 = pnand %p970_p9, %p967_p8 }
  0x18   :  { %975 = shalt.err (!%p972_p10)
}
  0x19   :  { %s976_s6 = scalar_lea.vmem %s1044_s15, 10240  ;;  %p981_p12 = scmp.lt.s32.totalorder %s1044_s15, %s1044_s15 }
  0x1a   :  { %p977_p11 = scmp.ne.s32.totalorder %s1044_s15, %s976_s6  ;;  %p982_p13 = scmp.lt.s32.totalorder %s976_s6, %s976_s6 }
  0x1c   :  { %p983_p0 = por %p982_p13, %p981_p12 }
  0x1e   :  { %p984_p1 = pnand %p983_p0, %p977_p11 }
  0x20   :  { %987 = shalt.err (!%p984_p1)
}
  0x21   :  { %s1018_s0 = smov 128   ;;  %s1019_s7 = smov 8  }
  0x22   :  { %32 = dma.hbm_to_vmem [thread:$0]  %s1157_s1, 10240, %s1044_s15, [#allocation6], %s1018_s0, %s1018_s0, %s1019_s7  }
  0x23   :  { %1010 = dma.done.wait [#allocation3], 128  }
  0x24   :  { %1011 = vsyncadd [#allocation3], 4294967168 }
  0x25   :  { %1012 = dma.done.wait [#allocation6], 10240  }
  0x26   :  { %1013 = vsyncadd [#allocation6], 4294957056  ;;  %v1020_v0 = vmov 0.0|0.0   ;;  %vm1021_vm0 = vmmov 0   ;;  %v1022_v1 = vmov 0.0   ;;  %v42_v2 = vld [vmem:[#allocation5] sm:$0xff] }
  0x27   :  { %812 = vmatprep.subr.bf16.mxu0 %v1020_v0  ;;  %669 = vmatprep.mubr.msk.f32.mxu0 %vm1021_vm0, %v1022_v1  ;;  %v43_v3 = vld [vmem:[#allocation5 + $0x8] sm:$0xff]  ;;  %v44_v4 = vld [vmem:[#allocation5 + $0x10] sm:$0xff]  ;;  %v45_v6 = vld [vmem:[#allocation5 + $0x18] sm:$0xff]  ;;  %s1023_s19 = smov [#allocation7]  }
  0x28   :  { %836 = vmatprep.subr.bf16.mxu1 %v1020_v0  ;;  %704 = vmatprep.mubr.msk.f32.mxu1 %vm1021_vm0, %v1022_v1  ;;  %v813_v5 = vpack.c.bf16 %v43_v3, %v42_v2  ;;  %v816_v7 = vpack.c.bf16 %v45_v6, %v44_v4  ;;  %v46_v8 = vld [vmem:[#allocation5 + $0x20] sm:$0xff]  ;;  %v47_v9 = vld [vmem:[#allocation5 + $0x28] sm:$0xff]  ;;  %v139_v12 = vld [vmem:[#allocation5 + $0x90] sm:$0xff]  ;;  %s533_s20 = sshll.u32 %s1023_s19, 4  ;;  %s534_s20 = int_to_ptr.vmem [resolvable:$true] %s533_s20 }
  0x29   :  { %v137_v10 = vld [vmem:[#allocation5 + $0x80] sm:$0xff]  ;;  %v138_v11 = vld [vmem:[#allocation5 + $0x88] sm:$0xff]  ;;  %v140_v13 = vld [vmem:[#allocation5 + $0x98] sm:$0xff]  ;;  %v819_v14 = vpack.c.bf16 %v47_v9, %v46_v8  ;;  %s988_s21 = scalar_lea.vmem %s534_s20, 128  ;;  %p993_p3 = scmp.lt.s32.totalorder %s534_s20, %s534_s20 }
  0x2a   :  { %814 = vmatpush3.bf16.msra.mxu0 %v813_v5  ;;  %v837_v15 = vpack.c.bf16 %v138_v11, %v137_v10  ;;  %v48_v16 = vld [vmem:[#allocation5 + $0x30] sm:$0xff]  ;;  %v49_v17 = vld [vmem:[#allocation5 + $0x38] sm:$0xff]  ;;  %v840_v18 = vpack.c.bf16 %v140_v13, %v139_v12  ;;  %v141_v19 = vld [vmem:[#allocation5 + $0xa0] sm:$0xff]  ;;  %p989_p2 = scmp.ne.s32.totalorder %s534_s20, %s988_s21  ;;  %p994_p4 = scmp.lt.s32.totalorder %s988_s21, %s988_s21 }
  0x2b   :  { %815 = vmatprep.subr.bf16.mxu0 %v1020_v0  ;;  %v142_v20 = vld [vmem:[#allocation5 + $0xa8] sm:$0xff]  ;;  %v822_v21 = vpack.c.bf16 %v49_v17, %v48_v16  ;;  %v50_v22 = vld [vmem:[#allocation5 + $0x40] sm:$0xff]  ;;  %v143_v25 = vld [vmem:[#allocation5 + $0xb0] sm:$0xff] }
  0x2c   :  { %838 = vmatpush3.bf16.msra.mxu1 %v837_v15  ;;  %v51_v23 = vld [vmem:[#allocation5 + $0x48] sm:$0xff]  ;;  %v843_v24 = vpack.c.bf16 %v142_v20, %v141_v19  ;;  %v144_v26 = vld [vmem:[#allocation5 + $0xb8] sm:$0xff]  ;;  %v52_v28 = vld [vmem:[#allocation5 + $0x50] sm:$0xff]  ;;  %p995_p5 = por %p994_p4, %p993_p3 }
  0x2d   :  { %839 = vmatprep.subr.bf16.mxu1 %v1020_v0  ;;  %v825_v27 = vpack.c.bf16 %v51_v23, %v50_v22  ;;  %v53_v29 = vld [vmem:[#allocation5 + $0x58] sm:$0xff]  ;;  %v846_v30 = vpack.c.bf16 %v144_v26, %v143_v25  ;;  %v145_v31 = vld [vmem:[#allocation5 + $0xc0] sm:$0xff]  ;;  %v146_v32 = vld [vmem:[#allocation5 + $0xc8] sm:$0xff] }
  0x2e   :  { %817 = vmatpush3.bf16.msra.mxu0 %v816_v7  ;;  %v828_v33 = vpack.c.bf16 %v53_v29, %v52_v28  ;;  %v54_v34 = vld [vmem:[#allocation5 + $0x60] sm:$0xff]  ;;  %v55_v35 = vld [vmem:[#allocation5 + $0x68] sm:$0xff]  ;;  %v849_v36 = vpack.c.bf16 %v146_v32, %v145_v31  ;;  %v147_v37 = vld [vmem:[#allocation5 + $0xd0] sm:$0xff]  ;;  %p996_p6 = pnand %p995_p5, %p989_p2 }
  0x2f   :  { %818 = vmatprep.subr.bf16.mxu0 %v1020_v0  ;;  %v148_v38 = vld [vmem:[#allocation5 + $0xd8] sm:$0xff]  ;;  %v831_v39 = vpack.c.bf16 %v55_v35, %v54_v34  ;;  %v56_v40 = vld [vmem:[#allocation5 + $0x70] sm:$0xff]  ;;  %v149_v43 = vld [vmem:[#allocation5 + $0xe0] sm:$0xff] }
  0x30   :  { %841 = vmatpush3.bf16.msra.mxu1 %v840_v18  ;;  %v57_v41 = vld [vmem:[#allocation5 + $0x78] sm:$0xff]  ;;  %v852_v42 = vpack.c.bf16 %v148_v38, %v147_v37  ;;  %v150_v44 = vld [vmem:[#allocation5 + $0xe8] sm:$0xff]  ;;  %v151_v48 = vld [vmem:[#allocation5 + $0xf0] sm:$0xff] }
  0x31   :  { %842 = vmatprep.subr.bf16.mxu1 %v1020_v0  ;;  %v834_v45 = vpack.c.bf16 %v57_v41, %v56_v40  ;;  %v855_v46 = vpack.c.bf16 %v150_v44, %v149_v43  ;;  %v1094_v47 = vld [vmem:[#allocation2] sm:$0xff]  ;;  %v233_v51 = vld [vmem:[#allocation5 + $0x100] sm:$0xff]  ;;  %v234_v52 = vld [vmem:[#allocation5 + $0x108] sm:$0xff] }
  0x32   :  { %820 = vmatpush3.bf16.msra.mxu0 %v819_v14  ;;  %v152_v49 = vld [vmem:[#allocation5 + $0xf8] sm:$0xff]  ;;  %v235_v53 = vld [vmem:[#allocation5 + $0x110] sm:$0xff]  ;;  %v861_v54 = vpack.c.bf16 %v234_v52, %v233_v51  ;;  %v237_v57 = vld [vmem:[#allocation5 + $0x120] sm:$0xff] }
  0x33   :  { %821 = vmatprep.subr.bf16.mxu0 %v1020_v0  ;;  %v858_v50 = vpack.c.bf16 %v152_v49, %v151_v48  ;;  %v236_v55 = vld [vmem:[#allocation5 + $0x118] sm:$0xff]  ;;  %v238_v58 = vld [vmem:[#allocation5 + $0x128] sm:$0xff]  ;;  %v239_v60 = vld [vmem:[#allocation5 + $0x130] sm:$0xff] }
  0x34   :  { %844 = vmatpush3.bf16.msra.mxu1 %v843_v24  ;;  %v864_v56 = vpack.c.bf16 %v236_v55, %v235_v53  ;;  %v867_v59 = vpack.c.bf16 %v238_v58, %v237_v57  ;;  %v240_v61 = vld [vmem:[#allocation5 + $0x138] sm:$0xff]  ;;  %v241_v63 = vld [vmem:[#allocation5 + $0x140] sm:$0xff]  ;;  %v242_v2 = vld [vmem:[#allocation5 + $0x148] sm:$0xff] }
  0x35   :  { %845 = vmatprep.subr.bf16.mxu1 %v1020_v0  ;;  %v870_v62 = vpack.c.bf16 %v240_v61, %v239_v60  ;;  %v873_v3 = vpack.c.bf16 %v242_v2, %v241_v63  ;;  %v243_v4 = vld [vmem:[#allocation5 + $0x150] sm:$0xff]  ;;  %v244_v5 = vld [vmem:[#allocation5 + $0x158] sm:$0xff]  ;;  %v245_v7 = vld [vmem:[#allocation5 + $0x160] sm:$0xff] }
  0x36   :  { %823 = vmatpush3.bf16.msra.mxu0 %v822_v21  ;;  %v876_v6 = vpack.c.bf16 %v244_v5, %v243_v4  ;;  %v246_v8 = vld [vmem:[#allocation5 + $0x168] sm:$0xff]  ;;  %v543_v10 = vld [vmem:[%s1158_s2] ss:$0 sm:$0xff]  ;;  %v247_v15 = vld [vmem:[#allocation5 + $0x170] sm:$0xff] }
  0x37   :  { %824 = vmatprep.subr.bf16.mxu0 %v1020_v0  ;;  %v879_v9 = vpack.c.bf16 %v246_v8, %v245_v7  ;;  %v248_v16 = vld [vmem:[#allocation5 + $0x178] sm:$0xff]  ;;  %v335_v18 = vld [vmem:[#allocation5 + $0x180] sm:$0xff]  ;;  %v336_v19 = vld [vmem:[#allocation5 + $0x188] sm:$0xff] }
  0x38   :  { %847 = vmatpush3.bf16.msra.mxu1 %v846_v30  ;;  %v882_v17 = vpack.c.bf16 %v248_v16, %v247_v15  ;;  %v337_v20 = vld [vmem:[#allocation5 + $0x190] sm:$0xff]  ;;  %v885_v21 = vpack.c.bf16 %v336_v19, %v335_v18  ;;  %v338_v22 = vld [vmem:[#allocation5 + $0x198] sm:$0xff]  ;;  %v339_v24 = vld [vmem:[#allocation5 + $0x1a0] sm:$0xff] }
  0x39   :  { %848 = vmatprep.subr.bf16.mxu1 %v1020_v0  ;;  %v888_v23 = vpack.c.bf16 %v338_v22, %v337_v20  ;;  %v340_v25 = vld [vmem:[#allocation5 + $0x1a8] sm:$0xff]  ;;  %v342_v28 = vld [vmem:[#allocation5 + $0x1b8] sm:$0xff]  ;;  %v343_v30 = vld [vmem:[#allocation5 + $0x1c0] sm:$0xff] }
  0x3a   :  { %826 = vmatpush3.bf16.msra.mxu0 %v825_v27  ;;  %v891_v26 = vpack.c.bf16 %v340_v25, %v339_v24  ;;  %v341_v27 = vld [vmem:[#allocation5 + $0x1b0] sm:$0xff]  ;;  %v344_v31 = vld [vmem:[#allocation5 + $0x1c8] sm:$0xff]  ;;  %v346_v34 = vld [vmem:[#allocation5 + $0x1d8] sm:$0xff] }
  0x3b   :  { %827 = vmatprep.subr.bf16.mxu0 %v1020_v0  ;;  %v894_v29 = vpack.c.bf16 %v342_v28, %v341_v27  ;;  %v897_v32 = vpack.c.bf16 %v344_v31, %v343_v30  ;;  %v348_v37 = vld [vmem:[#allocation5 + $0x1e8] sm:$0xff]  ;;  %v349_v44 = vld [vmem:[#allocation5 + $0x1f0] sm:$0xff]  ;;  %v431_v48 = vld [vmem:[#allocation5 + $0x200] sm:$0xff] }
  0x3c   :  { %850 = vmatpush3.bf16.msra.mxu1 %v849_v36  ;;  %v347_v36 = vld [vmem:[#allocation5 + $0x1e0] sm:$0xff]  ;;  %v432_v49 = vld [vmem:[#allocation5 + $0x208] sm:$0xff]  ;;  %v434_v52 = vld [vmem:[#allocation5 + $0x218] sm:$0xff] }
  0x3d   :  { %851 = vmatprep.subr.bf16.mxu1 %v1020_v0  ;;  %v903_v38 = vpack.c.bf16 %v348_v37, %v347_v36  ;;  %v909_v51 = vpack.c.bf16 %v432_v49, %v431_v48  ;;  %v436_v55 = vld [vmem:[#allocation5 + $0x228] sm:$0xff]  ;;  %v438_v57 = vld [vmem:[#allocation5 + $0x238] sm:$0xff]  ;;  %v441_v8 = vld [vmem:[#allocation5 + $0x250] sm:$0xff] }
  0x3e   :  { %829 = vmatpush3.bf16.msra.mxu0 %v828_v33  ;;  %v345_v33 = vld [vmem:[#allocation5 + $0x1d0] sm:$0xff]  ;;  %v440_v60 = vld [vmem:[#allocation5 + $0x248] sm:$0xff]  ;;  %v547_v2 = vld [vmem:[%s1158_s2 + $0x2] ss:$0 sm:$0xff] }
  0x3f   :  { %830 = vmatprep.subr.bf16.mxu0 %v1020_v0  ;;  %v900_v35 = vpack.c.bf16 %v346_v34, %v345_v33  ;;  %v446_v15 = vld [vmem:[#allocation5 + $0x278] sm:$0xff] }
  0x40   :  { %853 = vmatpush3.bf16.msra.mxu1 %v852_v42 }
  0x41   :  { %854 = vmatprep.subr.bf16.mxu1 %v1020_v0 }
  0x42   :  { %832 = vmatpush3.bf16.msra.mxu0 %v831_v39  ;;  %v545_v39 = vld [vmem:[%s1158_s2 + $0x1] ss:$0 sm:$0xff] }
  0x43   :  { %833 = vmatprep.subr.bf16.mxu0 %v1020_v0 }
  0x44   :  { %856 = vmatpush3.bf16.msra.mxu1 %v855_v46 }
  0x45   :  { %857 = vmatprep.subr.bf16.mxu1 %v1020_v0 }
  0x46   :  { %835 = vmatpush3.bf16.msra.mxu0 %v834_v45  ;;  %v350_v45 = vld [vmem:[#allocation5 + $0x1f8] sm:$0xff] }
  0x47   :  { %860 = vmatprep.subr.bf16.mxu0 %v1020_v0  ;;  %v906_v46 = vpack.c.bf16 %v350_v45, %v349_v44 }
  0x48   :  { %859 = vmatpush3.bf16.msra.mxu1 %v858_v50  ;;  %v433_v50 = vld [vmem:[#allocation5 + $0x210] sm:$0xff] }
  0x49   :  { %670 = vmatmul.mubr.f32.vlgmr.msra.gmra.mrb[0].mxu0 %v1094_v47  ;;  %884 = vmatprep.subr.bf16.mxu1 %v1020_v0  ;;  %v912_v53 = vpack.c.bf16 %v434_v52, %v433_v50 }
  0x4a   :  { %739 = vmatprep.mubr.msk.f32.mxu0 %vm1021_vm0, %v1022_v1  ;;  %862 = vmatpush3.bf16.msra.mxu0 %v861_v54  ;;  %v435_v54 = vld [vmem:[#allocation5 + $0x220] sm:$0xff] }
  0x4b   :  { %863 = vmatprep.subr.bf16.mxu0 %v1020_v0 }
  0x4e   :  { %865 = vmatpush3.bf16.msra.mxu0 %v864_v56  ;;  %v915_v56 = vpack.c.bf16 %v436_v55, %v435_v54 }
  0x4f   :  { %866 = vmatprep.subr.bf16.mxu0 %v1020_v0 }
  0x52   :  { %868 = vmatpush3.bf16.msra.mxu0 %v867_v59  ;;  %v439_v59 = vld [vmem:[#allocation5 + $0x240] sm:$0xff] }
  0x53   :  { %869 = vmatprep.subr.bf16.mxu0 %v1020_v0  ;;  %v921_v61 = vpack.c.bf16 %v440_v60, %v439_v59 }
  0x56   :  { %871 = vmatpush3.bf16.msra.mxu0 %v870_v62  ;;  %v327_v62 = vlaneseq }
  0x57   :  { %872 = vmatprep.subr.bf16.mxu0 %v1020_v0 }
  0x58   :  { %v328_v63 = vand.u32 127, %v327_v62 }
  0x5a   :  { %874 = vmatpush3.bf16.msra.mxu0 %v873_v3  ;;  %vm329_vm1 = vcmp.ge.s32.totalorder %v328_v63, 32  ;;  %vm330_vm2 = vcmp.lt.s32.totalorder %v328_v63, 40 }
  0x5b   :  { %875 = vmatprep.subr.bf16.mxu0 %v1020_v0  ;;  %vm331_vm3 = vmand %vm329_vm1, %vm330_vm2 }
  0x5c   :  { %v332_v3 = vsel %vm331_vm3, %v1094_v47, 0.0  ;;  %v549_v47 = vld [vmem:[%s1158_s2 + $0x3] ss:$0 sm:$0xff] }
  0x5e   :  { %877 = vmatpush3.bf16.msra.mxu0 %v876_v6 }
  0x5f   :  { %878 = vmatprep.subr.bf16.mxu0 %v1020_v0 }
  0x62   :  { %880 = vmatpush3.bf16.msra.mxu0 %v879_v9  ;;  %v442_v9 = vld [vmem:[#allocation5 + $0x258] sm:$0xff] }
  0x63   :  { %881 = vmatprep.subr.bf16.mxu0 %v1020_v0 }
  0x66   :  { %883 = vmatpush3.bf16.msra.mxu0 %v882_v17 }
  0x67   :  { %908 = vmatprep.subr.bf16.mxu0 %v1020_v0 }
 0x11c   :  { %v131_v11 = vpop.f32.mrb[0].mxu0 }
 0x11d   :  { %v132_v12 = vadd.f32 %v543_v10, %v131_v11  ;;  %v671_v13 = vpop.f32.mrb[1].mxu0  ;;  %v924_v10 = vpack.c.bf16 %v442_v9, %v441_v8  ;;  %v443_v11 = vld [vmem:[#allocation5 + $0x260] sm:$0xff] }
 0x11f   :  { %v135_v14 = vmax.f32 %v132_v12, 0.0  ;;  %v444_v12 = vld [vmem:[#allocation5 + $0x268] sm:$0xff] }
 0x120   :  { %v927_v13 = vpack.c.bf16 %v444_v12, %v443_v11 }
 0x121   :  { %705 = vmatmul.mubr.f32.vlgmr.msra.gmra.mrb[0].mxu1 %v135_v14  ;;  %v445_v14 = vld [vmem:[#allocation5 + $0x270] sm:$0xff] }
 0x122   :  { %774 = vmatprep.mubr.msk.f32.mxu1 %vm1021_vm0, %v1022_v1  ;;  %886 = vmatpush3.bf16.msra.mxu1 %v885_v21  ;;  %v930_v16 = vpack.c.bf16 %v446_v15, %v445_v14  ;;  %v551_v21 = vld [vmem:[%s1158_s2 + $0x4] ss:$0 sm:$0xff] }
 0x123   :  { %887 = vmatprep.subr.bf16.mxu1 %v1020_v0 }
 0x126   :  { %889 = vmatpush3.bf16.msra.mxu1 %v888_v23 }
 0x127   :  { %890 = vmatprep.subr.bf16.mxu1 %v1020_v0 }
 0x12a   :  { %892 = vmatpush3.bf16.msra.mxu1 %v891_v26 }
 0x12b   :  { %893 = vmatprep.subr.bf16.mxu1 %v1020_v0 }
 0x12e   :  { %895 = vmatpush3.bf16.msra.mxu1 %v894_v29 }
 0x12f   :  { %896 = vmatprep.subr.bf16.mxu1 %v1020_v0 }
 0x132   :  { %898 = vmatpush3.bf16.msra.mxu1 %v897_v32 }
 0x133   :  { %899 = vmatprep.subr.bf16.mxu1 %v1020_v0 }
 0x136   :  { %901 = vmatpush3.bf16.msra.mxu1 %v900_v35 }
 0x137   :  { %902 = vmatprep.subr.bf16.mxu1 %v1020_v0 }
 0x13a   :  { %904 = vmatpush3.bf16.msra.mxu1 %v903_v38 }
 0x13b   :  { %905 = vmatprep.subr.bf16.mxu1 %v1020_v0 }
 0x13e   :  { %907 = vmatpush3.bf16.msra.mxu1 %v906_v46 }
 0x1f4   :  { %v227_v40 = vpop.f32.mrb[0].mxu1 }
 0x1f5   :  { %v228_v41 = vadd.f32 %v545_v39, %v227_v40  ;;  %v706_v42 = vpop.f32.mrb[1].mxu1 }
 0x1f7   :  { %v231_v43 = vmax.f32 %v228_v41, 0.0 }
 0x1f9   :  { %740 = vmatmul.mubr.f32.vlgmr.msra.gmra.mrb[2].mxu0 %v231_v43 }
 0x1fa   :  { %809 = vmatprep.mubr.msk.f32.mxu0 %vm1021_vm0, %v1022_v1  ;;  %910 = vmatpush3.bf16.msra.mxu0 %v909_v51  ;;  %v437_v1 = vld [vmem:[#allocation5 + $0x230] sm:$0xff] }
 0x1fb   :  { %911 = vmatprep.subr.bf16.mxu0 %v1020_v0  ;;  %v918_v58 = vpack.c.bf16 %v438_v57, %v437_v1 }
 0x1fe   :  { %913 = vmatpush3.bf16.msra.mxu0 %v912_v53 }
 0x1ff   :  { %914 = vmatprep.subr.bf16.mxu0 %v1020_v0 }
 0x202   :  { %916 = vmatpush3.bf16.msra.mxu0 %v915_v56 }
 0x203   :  { %917 = vmatprep.subr.bf16.mxu0 %v1020_v0 }
 0x206   :  { %919 = vmatpush3.bf16.msra.mxu0 %v918_v58 }
 0x207   :  { %920 = vmatprep.subr.bf16.mxu0 %v1020_v0 }
 0x20a   :  { %922 = vmatpush3.bf16.msra.mxu0 %v921_v61 }
 0x20b   :  { %923 = vmatprep.subr.bf16.mxu0 %v1020_v0 }
 0x20e   :  { %925 = vmatpush3.bf16.msra.mxu0 %v924_v10 }
 0x20f   :  { %926 = vmatprep.subr.bf16.mxu0 %v1020_v0 }
 0x212   :  { %928 = vmatpush3.bf16.msra.mxu0 %v927_v13 }
 0x213   :  { %929 = vmatprep.subr.bf16.mxu0 %v1020_v0 }
 0x216   :  { %931 = vmatpush3.bf16.msra.mxu0 %v930_v16 }
 0x2cc   :  { %v323_v4 = vpop.f32.mrb[2].mxu0 }
 0x2cd   :  { %v324_v5 = vadd.f32 %v547_v2, %v323_v4  ;;  %v741_v6 = vpop.f32.mrb[3].mxu0 }
 0x2cf   :  { %v333_v7 = vadd.f32 %v332_v3, %v324_v5 }
 0x2d1   :  { %775 = vmatmul.mubr.f32.vlgmr.msra.gmra.mrb[2].mxu1 %v333_v7 }
 0x3a4   :  { %v425_v17 = vpop.f32.mrb[2].mxu1 }
 0x3a5   :  { %v426_v18 = vadd.f32 %v549_v47, %v425_v17  ;;  %v776_v19 = vpop.f32.mrb[3].mxu1 }
 0x3a7   :  { %940 = vtanh.f32 %v426_v18 }
 0x3b1   :  { %v941_v20 = vpop.eup %940 }
 0x3b2   :  { %810 = vmatmul.mubr.f32.vlgmr.msra.gmra.mrb[4].mxu0 %v941_v20 }
 0x485   :  { %v521_v22 = vpop.f32.mrb[4].mxu0 }
 0x486   :  { %v522_v23 = vadd.f32 %v551_v21, %v521_v22  ;;  %v811_v24 = vpop.f32.mrb[5].mxu0 }
 0x488   :  { %942 = vtanh.f32 %v522_v23 }
 0x492   :  { %v943_v0 = vpop.eup %942 }
 0x493   :  { %526 = vst [vmem:[#allocation7] sm:$0xff] %v943_v0 }
 0x494   :  { %999 = shalt.err (!%p996_p6)
}
 0x495   :  { %s1000_s2 = scalar_lea.hbm %s1159_s3, 128 }
 0x496   :  { %p1001_p7 = scmp.ne.s32.totalorder %s1159_s3, %s1000_s2  ;;  %p1004_p8 = scmp.lt.u32.totalorder %s1000_s2, %s1159_s3 }
 0x498   :  { %p1006_p9 = pnand %p1004_p8, %p1001_p7 }
 0x49a   :  { %1009 = shalt.err (!%p1006_p9)
}
 0x49b   :  { %536 = dma.vmem_to_hbm [thread:$0]  %s534_s20, 128, %s1159_s3, [#allocation4]  }
 0x49c   :  { %1014 = dma.done.wait [#allocation4], 128  }
 0x49d   :  { %1015 = vsyncadd [#allocation4], 4294967168 }
 0x49e   :  { %540 = vsyncpa [#allocation3], 1 }
 0x49f   :  { %541 = vsyncpa [#allocation6], 1 }
 0x4a0   :  { %542 = vsyncpa [#allocation4], 1 }

</bundles_post_ra>
